<compile_context>
chip_gen: v5e
topology: v5e:2x2
jax: 0.10.0
libtpu: 0.0.40
codegen_flags: <defaults>
</compile_context>

<pallas_src>
import functools
import math

import jax
import jax.numpy as jnp
from jax.experimental import pallas as pl
from jax.experimental.pallas import tpu as pltpu

_MIB = 1024 * 1024


def _round_up(x: int, m: int) -> int:
    return ((x + m - 1) // m) * m


def _vmem_capacity_bytes() -> int:
    try:
        return int(pltpu.get_tpu_info().vmem_capacity_bytes)
    except Exception:
        return 64 * _MIB  # conservative: v7x per-TensorCore VMEM


def _default_out_dtype():
    # bf16 output on bandwidth-poor v5e/v6e (compute stays f32); f32 elsewhere.
    try:
        kind = jax.devices()[0].device_kind.lower()
    except Exception:
        return jnp.float32
    if "v5 lite" in kind or "v5e" in kind or "v6" in kind:
        return jnp.bfloat16
    return jnp.float32


# --- sin/cos with a single shared range reduction ---------------------------
# Argument is reduced once to r in [-pi/4, pi/4] plus a quadrant q; both sin
# and cos of the original argument are then recovered from the same (r, q)
# with two short minimax polynomials (cephes single-precision coefficients),
# instead of two independent jnp.sin / jnp.cos expansions each doing their own
# range reduction.
_TWO_OVER_PI = 0.6366197723675814
_PIO2_1 = 1.5703125                    # exact in f32
_PIO2_2 = 4.837512969970703125e-4      # exact in f32
_PIO2_3 = 7.54978995489188e-8


def _sincos(prod):
    # floor(x + 0.5) instead of round(): identical here (half-way cases land on
    # r = +/- pi/4, inside the polynomial domain) and guaranteed to lower.
    k = jnp.floor(prod * _TWO_OVER_PI + 0.5)
    r = ((prod - k * _PIO2_1) - k * _PIO2_2) - k * _PIO2_3   # |r| <= pi/4
    z = r * r
    sr = ((-1.9515295891e-4 * z + 8.3321608736e-3) * z
          - 1.6666654611e-1) * z * r + r
    cr = ((2.443315711809948e-5 * z - 1.388731625493765e-3) * z
          + 4.166664568298827e-2) * z * z - 0.5 * z + 1.0
    # Quadrant bookkeeping (two's complement & handles negative k correctly).
    # NOTE: int32 conversion limits |prod| to ~3e9, ample for pos-encoding use.
    q = k.astype(jnp.int32) & 3
    swap = (q & 1) != 0
    s = jnp.where(swap, cr, sr)
    c = jnp.where(swap, sr, cr)
    s = jnp.where((q & 2) != 0, -s, s)          # sin flips in quadrants 2, 3
    c = jnp.where(((q + 1) & 2) != 0, -c, c)    # cos flips in quadrants 1, 2
    return s, c


def _fourier_kernel(x_ref, w_ref, o_ref, *, d2: int, scale):
    # x_ref: (TN, 1) f32, w_ref: (1, d2) f32 (resident), o_ref: (TN, 2*d2)
    x = x_ref[...]                       # (TN, 1)
    w = w_ref[...]                       # (1, d2)
    # Outer product via VPU broadcast multiply; a K=1 MXU matmul would waste
    # the systolic array and add result-FIFO latency for nothing.
    prod = x * w                         # (TN, d2) f32
    s, c = _sincos(prod)
    if scale is not None:
        # normalize=True: per-row L2 norm is exactly sqrt(d2) (sin^2+cos^2=1),
        # so the reduction collapses to one compile-time constant multiply.
        s = s * scale
        c = c * scale
    # Lane-aligned split stores; no (TN, dim) concat temp is materialized.
    o_ref[:, :d2] = s.astype(o_ref.dtype)
    o_ref[:, d2:] = c.astype(o_ref.dtype)


def fourier_positional_encoding(x, w, *, normalize: bool = False,
                                tile_n: int = 1024, out_dtype=None):
    """x: (N,) or (N,1) float; w: (dim//2, 1) float -> (N, dim) out_dtype."""
    if out_dtype is None:
        out_dtype = _default_out_dtype()
    if x.ndim == 1:
        x = x[:, None]                   # (N, 1)
    x = x.astype(jnp.float32)
    n = x.shape[0]
    d2 = w.shape[0]
    dim = 2 * d2
    w_row = w.astype(jnp.float32).reshape(1, d2)   # (1, d2) -- stays resident

    out_itemsize = jnp.dtype(out_dtype).itemsize
    sublane = 16 if out_itemsize < 4 else 8        # packed bf16 stores

    # Per-row VMEM cost: double-buffered output tile + double-buffered x tile
    # (lane-padded to 128) + f32 kernel temporaries (prod, r, sin, cos).
    per_row = 2 * dim * out_itemsize + 2 * 128 * 4 + 4 * d2 * 4
    vmem_cap = _vmem_capacity_bytes()
    budget = min(24 * _MIB, vmem_cap // 2)          # leave pipeline headroom
    max_rows = max(sublane, (budget // per_row) // sublane * sublane)

    # Row tile: multiple of `sublane`, no larger than N (rounded up), capped by
    # the VMEM budget, amortizing per-step overhead for large N.
    eff_tile = max(sublane, min(_round_up(max(tile_n, 1), sublane),
                                _round_up(n, sublane),
                                max_rows))
    # Guarantee >= 2 grid steps whenever N allows, so dimension_semantics
    # ("parallel",) can shard rows across v7x's two TensorCores (no-op on
    # single-TC v5e/v6e beyond one extra ~0.35us grid step).
    if n > sublane:
        eff_tile = min(eff_tile, _round_up(pl.cdiv(n, 2), sublane))

    grid = (pl.cdiv(n, eff_tile),)

    vmem_needed = eff_tile * per_row + 2 * 8 * _round_up(d2, 128) * 4
    # Always set the scoped-VMEM limit (v5e default is only 16 MiB), but never
    # request anywhere near physical capacity (v7x has 64 MiB per TC).
    vmem_limit = int(min(max(32 * _MIB, vmem_needed * 1.25), vmem_cap * 3 // 4))
    compiler_params = pltpu.CompilerParams(
        dimension_semantics=("parallel",),
        vmem_limit_bytes=vmem_limit)

    scale = (1.0 / math.sqrt(d2)) if normalize else None
    kernel = functools.partial(_fourier_kernel, d2=d2, scale=scale)

    # TODO(synk): for very large dim (>~8k) add a feature-axis grid dimension
    # to cap per-step VMEM independently of dim.
    return pl.pallas_call(
        kernel,
        out_shape=jax.ShapeDtypeStruct((n, dim), out_dtype),
        grid_spec=pltpu.PrefetchScalarGridSpec(
            num_scalar_prefetch=0,
            grid=grid,
            in_specs=[
                pl.BlockSpec((eff_tile, 1), lambda i: (i, 0)),   # x tile
                pl.BlockSpec((1, d2), lambda i: (0, 0)),          # w (resident)
            ],
            out_specs=pl.BlockSpec((eff_tile, dim), lambda i: (i, 0)),
        ),
        compiler_params=compiler_params,
    )(x, w_row)


def _reference(x, w, normalize):
    # Faithful to the torch module: v = cat([sin(w @ x.T), cos(w @ x.T)]);
    # v = v / v.norm(dim=0); return v.T.  (K=1 matmul == broadcast outer prod.)
    if x.ndim == 1:
        x = x[:, None]
    prod = x.astype(jnp.float32) * w.astype(jnp.float32).reshape(1, -1)
    v = jnp.concatenate([jnp.sin(prod), jnp.cos(prod)], axis=1)
    if normalize:
        v = v / jnp.linalg.norm(v, axis=1, keepdims=True)
    return v


if __name__ == "__main__":
    key = jax.random.PRNGKey(0)
    kw1, kx1, kw2, kx2, kw3, kx3 = jax.random.split(key, 6)
    sigma_x = 10.0

    # Case 1: module defaults (dim=128 -> d2=64), normalize=True, N=8 scalars.
    dim1 = 128
    w1 = jax.random.normal(kw1, (dim1 // 2, 1), dtype=jnp.float32) * sigma_x
    x1 = jax.random.uniform(kx1, (8,), dtype=jnp.float32)
    out1 = jax.block_until_ready(
        fourier_positional_encoding(x1, w1, normalize=True,
                                    out_dtype=jnp.float32))
    ref1 = _reference(x1, w1, True)
    assert out1.shape == (8, dim1), out1.shape
    err1 = float(jnp.max(jnp.abs(out1 - ref1)))
    assert err1 < 2e-4, err1

    # Case 2: dim=256 (d2=128), N=1000 (ragged last block), tile_n=512.
    dim2 = 256
    w2 = jax.random.normal(kw2, (dim2 // 2, 1), dtype=jnp.float32) * sigma_x
    x2 = jax.random.uniform(kx2, (1000,), dtype=jnp.float32)
    out2 = jax.block_until_ready(
        fourier_positional_encoding(x2, w2, normalize=False, tile_n=512,
                                    out_dtype=jnp.float32))
    ref2 = _reference(x2, w2, False)
    assert out2.shape == (1000, dim2), out2.shape
    err2 = float(jnp.max(jnp.abs(out2 - ref2)))
    assert err2 < 2e-4, err2

    # Case 3: bf16 output path (v5e/v6e bandwidth saver), N=500, normalize=True.
    dim3 = 256
    w3 = jax.random.normal(kw3, (dim3 // 2, 1), dtype=jnp.float32) * sigma_x
    x3 = jax.random.uniform(kx3, (500,), dtype=jnp.float32)
    out3 = jax.block_until_ready(
        fourier_positional_encoding(x3, w3, normalize=True, tile_n=256,
                                    out_dtype=jnp.bfloat16))
    ref3 = _reference(x3, w3, True)
    assert out3.shape == (500, dim3), out3.shape
    err3 = float(jnp.max(jnp.abs(out3.astype(jnp.float32) - ref3)))
    assert err3 < 5e-3, err3

    print("KERNEL_OK")
</pallas_src>

<mosaic_0001>
module attributes {stable_mosaic.version = 11 : i64} {
  func.func @_fourier_kernel(%arg0: i32, %arg1: memref<8x1xf32, #tpu.memory_space<vmem>>, %arg2: memref<1x64xf32, #tpu.memory_space<vmem>>, %arg3: memref<8x128xf32, #tpu.memory_space<vmem>>) attributes {dimension_semantics = [#tpu.dimension_semantics<parallel>], iteration_bounds = array<i64: 1>, scalar_prefetch = 0 : i64, scratch_operands = 0 : i64, tpu.core_type = #tpu.core_type<tc>, window_params = [{transform_indices = @transform_0, window_bounds = array<i64: 8, 1>}, {pipeline_mode = #tpu.pipeline_mode<synchronous>, transform_indices = @transform_1, window_bounds = array<i64: 1, 64>}, {transform_indices = @transform_2, window_bounds = array<i64: 8, 128>}]} {
    %c0 = arith.constant 0 : index
    %c0_0 = arith.constant 0 : index
    %0 = vector.load %arg1[%c0, %c0_0] : memref<8x1xf32, #tpu.memory_space<vmem>>, vector<8x1xf32>
    %c0_1 = arith.constant 0 : index
    %c0_2 = arith.constant 0 : index
    %1 = vector.load %arg2[%c0_1, %c0_2] : memref<1x64xf32, #tpu.memory_space<vmem>>, vector<1x64xf32>
    %2 = vector.broadcast %0 : vector<8x1xf32> to vector<8x64xf32>
    %3 = vector.broadcast %1 : vector<1x64xf32> to vector<8x64xf32>
    %4 = arith.mulf %2, %3 : vector<8x64xf32>
    %cst = arith.constant 0.636619746 : f32
    %5 = vector.broadcast %cst : f32 to vector<8x64xf32>
    %6 = arith.mulf %4, %5 : vector<8x64xf32>
    %cst_3 = arith.constant 5.000000e-01 : f32
    %7 = vector.broadcast %cst_3 : f32 to vector<8x64xf32>
    %8 = arith.addf %6, %7 : vector<8x64xf32>
    %9 = math.floor %8 : vector<8x64xf32>
    %cst_4 = arith.constant 1.5703125 : f32
    %10 = vector.broadcast %cst_4 : f32 to vector<8x64xf32>
    %11 = arith.mulf %9, %10 : vector<8x64xf32>
    %12 = arith.subf %4, %11 : vector<8x64xf32>
    %cst_5 = arith.constant 4.83751297E-4 : f32
    %13 = vector.broadcast %cst_5 : f32 to vector<8x64xf32>
    %14 = arith.mulf %9, %13 : vector<8x64xf32>
    %15 = arith.subf %12, %14 : vector<8x64xf32>
    %cst_6 = arith.constant 7.549790e-08 : f32
    %16 = vector.broadcast %cst_6 : f32 to vector<8x64xf32>
    %17 = arith.mulf %9, %16 : vector<8x64xf32>
    %18 = arith.subf %15, %17 : vector<8x64xf32>
    %19 = arith.mulf %18, %18 : vector<8x64xf32>
    %cst_7 = arith.constant -1.95152956E-4 : f32
    %20 = vector.broadcast %cst_7 : f32 to vector<8x64xf32>
    %21 = arith.mulf %20, %19 : vector<8x64xf32>
    %cst_8 = arith.constant 0.00833216123 : f32
    %22 = vector.broadcast %cst_8 : f32 to vector<8x64xf32>
    %23 = arith.addf %21, %22 : vector<8x64xf32>
    %24 = arith.mulf %23, %19 : vector<8x64xf32>
    %cst_9 = arith.constant 0.166666552 : f32
    %25 = vector.broadcast %cst_9 : f32 to vector<8x64xf32>
    %26 = arith.subf %24, %25 : vector<8x64xf32>
    %27 = arith.mulf %26, %19 : vector<8x64xf32>
    %28 = arith.mulf %27, %18 : vector<8x64xf32>
    %29 = arith.addf %28, %18 : vector<8x64xf32>
    %cst_10 = arith.constant 2.44331568E-5 : f32
    %30 = vector.broadcast %cst_10 : f32 to vector<8x64xf32>
    %31 = arith.mulf %30, %19 : vector<8x64xf32>
    %cst_11 = arith.constant 0.00138873165 : f32
    %32 = vector.broadcast %cst_11 : f32 to vector<8x64xf32>
    %33 = arith.subf %31, %32 : vector<8x64xf32>
    %34 = arith.mulf %33, %19 : vector<8x64xf32>
    %cst_12 = arith.constant 0.0416666456 : f32
    %35 = vector.broadcast %cst_12 : f32 to vector<8x64xf32>
    %36 = arith.addf %34, %35 : vector<8x64xf32>
    %37 = arith.mulf %36, %19 : vector<8x64xf32>
    %38 = arith.mulf %37, %19 : vector<8x64xf32>
    %cst_13 = arith.constant 5.000000e-01 : f32
    %39 = vector.broadcast %cst_13 : f32 to vector<8x64xf32>
    %40 = arith.mulf %39, %19 : vector<8x64xf32>
    %41 = arith.subf %38, %40 : vector<8x64xf32>
    %cst_14 = arith.constant 1.000000e+00 : f32
    %42 = vector.broadcast %cst_14 : f32 to vector<8x64xf32>
    %43 = arith.addf %41, %42 : vector<8x64xf32>
    %44 = arith.fptosi %9 : vector<8x64xf32> to vector<8x64xi32>
    %c3_i32 = arith.constant 3 : i32
    %45 = vector.broadcast %c3_i32 : i32 to vector<8x64xi32>
    %46 = arith.andi %44, %45 : vector<8x64xi32>
    %c1_i32 = arith.constant 1 : i32
    %47 = vector.broadcast %c1_i32 : i32 to vector<8x64xi32>
    %48 = arith.andi %46, %47 : vector<8x64xi32>
    %c0_i32 = arith.constant 0 : i32
    %49 = vector.broadcast %c0_i32 : i32 to vector<8x64xi32>
    %50 = arith.cmpi ne, %48, %49 : vector<8x64xi32>
    %51 = arith.select %50, %43, %29 : vector<8x64xi1>, vector<8x64xf32>
    %52 = arith.select %50, %29, %43 : vector<8x64xi1>, vector<8x64xf32>
    %c2_i32 = arith.constant 2 : i32
    %53 = vector.broadcast %c2_i32 : i32 to vector<8x64xi32>
    %54 = arith.andi %46, %53 : vector<8x64xi32>
    %c0_i32_15 = arith.constant 0 : i32
    %55 = vector.broadcast %c0_i32_15 : i32 to vector<8x64xi32>
    %56 = arith.cmpi ne, %54, %55 : vector<8x64xi32>
    %cst_16 = arith.constant 0.000000e+00 : f32
    %57 = vector.broadcast %cst_16 : f32 to vector<8x64xf32>
    %58 = arith.subf %57, %51 : vector<8x64xf32>
    %59 = arith.select %56, %58, %51 : vector<8x64xi1>, vector<8x64xf32>
    %c1_i32_17 = arith.constant 1 : i32
    %60 = vector.broadcast %c1_i32_17 : i32 to vector<8x64xi32>
    %61 = arith.addi %46, %60 : vector<8x64xi32>
    %c2_i32_18 = arith.constant 2 : i32
    %62 = vector.broadcast %c2_i32_18 : i32 to vector<8x64xi32>
    %63 = arith.andi %61, %62 : vector<8x64xi32>
    %c0_i32_19 = arith.constant 0 : i32
    %64 = vector.broadcast %c0_i32_19 : i32 to vector<8x64xi32>
    %65 = arith.cmpi ne, %63, %64 : vector<8x64xi32>
    %cst_20 = arith.constant 0.000000e+00 : f32
    %66 = vector.broadcast %cst_20 : f32 to vector<8x64xf32>
    %67 = arith.subf %66, %52 : vector<8x64xf32>
    %68 = arith.select %65, %67, %52 : vector<8x64xi1>, vector<8x64xf32>
    %cst_21 = arith.constant 1.250000e-01 : f32
    %69 = vector.broadcast %cst_21 : f32 to vector<8x64xf32>
    %70 = arith.mulf %59, %69 : vector<8x64xf32>
    %cst_22 = arith.constant 1.250000e-01 : f32
    %71 = vector.broadcast %cst_22 : f32 to vector<8x64xf32>
    %72 = arith.mulf %68, %71 : vector<8x64xf32>
    %c0_23 = arith.constant 0 : index
    %c0_24 = arith.constant 0 : index
    %73 = vector.load %arg3[%c0_23, %c0_24] : memref<8x128xf32, #tpu.memory_space<vmem>>, vector<8x64xf32>
    tpu.vector_store %arg3[%c0_23, %c0_24], %70 {strides = array<i32>} : memref<8x128xf32, #tpu.memory_space<vmem>>, vector<8x64xf32>,
    %c0_25 = arith.constant 0 : index
    %c64 = arith.constant 64 : index
    %74 = vector.load %arg3[%c0_25, %c64] : memref<8x128xf32, #tpu.memory_space<vmem>>, vector<8x64xf32>
    tpu.vector_store %arg3[%c0_25, %c64], %72 {strides = array<i32>} : memref<8x128xf32, #tpu.memory_space<vmem>>, vector<8x64xf32>,
    return
  }
  func.func @transform_0(%arg0: i32) -> (i32, i32) {
    %c0_i32 = arith.constant 0 : i32
    %c0_i32_0 = arith.constant 0 : i32
    return %arg0, %c0_i32 : i32, i32
  }
  func.func @transform_1(%arg0: i32) -> (i32, i32) {
    %c0_i32 = arith.constant 0 : i32
    %c0_i32_0 = arith.constant 0 : i32
    %c0_i32_1 = arith.constant 0 : i32
    return %c0_i32, %c0_i32_0 : i32, i32
  }
  func.func @transform_2(%arg0: i32) -> (i32, i32) {
    %c0_i32 = arith.constant 0 : i32
    %c0_i32_0 = arith.constant 0 : i32
    return %arg0, %c0_i32 : i32, i32
  }
}

</mosaic_0001>

<bundles_post_ra>
// kernel: tpu_custom_call.1
= control target key start
LH: loop header
LB: loop body
LE: loop exit
PB: predicated region body
PF: predicated region fallthrough
CT: control target
= control target key end

     0   :  { %v125_v1 = vmov 0   ;;  %s152_s0 = inlined_call_operand.vmem [shape: f32[8,1], index: 0, kind: input, shape index: {}]   ;;  %s153_s1 = inlined_call_operand.vmem [shape: f32[1,64], index: 1, kind: input, shape index: {}]   ;;  %s154_s2 = inlined_call_operand.hbm [shape: f32[8,128], index: 2, kind: output, shape index: {}]  }
   0x1   :  { %v12_v0 = vld [vmem:[%s152_s0] sm:$0xff]  ;;  %97 = vset.pattern.permute.xlu0 %v125_v1 }
   0x2   :  { %7 = vsyncpa [#allocation3], 0  ;;  %16 = vperm.xlu0 %97, %v12_v0   ;;  %v98_v2 = vld [vmem:[%s153_s1] ss:$0 sm:$0xff]  ;;  %vm66_vm3 = vcmask 523264   ;;  %s126_s0 = smov 64  }
   0x3   :  { %s127_s1 = smov [#allocation2]   ;;  %s81_s16 = sshll.u32 %s154_s2, 4  ;;  %vm72_vm4 = vcmask 1048064   ;;  %s82_s16 = int_to_ptr.hbm [resolvable:$true] %s81_s16 }
   0x4   :  { %s79_s13 = sshll.u32 %s127_s1, 4  ;;  %s80_s13 = int_to_ptr.vmem [resolvable:$true] %s79_s13 }
  0x74   :  { %v17_v3 = vpop.permute.xlu0 %16 }
  0x75   :  { %v22_v4 = vmul.f32 %v98_v2, %v17_v3 }
  0x77   :  { %v23_v5 = vmul.f32 0.63661975, %v22_v4 }
  0x79   :  { %v24_v6 = vadd.f32 0.5, %v23_v5 }
  0x7b   :  { %v25_v7 = vfloor.f32 %v24_v6 }
  0x7d   :  { %v26_v8 = vmul.f32 1.5703125, %v25_v7  ;;  %v28_v10 = vmul.f32 0.0004837513, %v25_v7  ;;  %v30_v12 = vmul.f32 7.54979e-08, %v25_v7  ;;  %v93_v18 = vcvt.f32.s32 %v25_v7 }
  0x7f   :  { %v27_v9 = vsub.f32 %v22_v4, %v26_v8  ;;  %v50_v24 = vand.u32 3, %v93_v18 }
  0x81   :  { %v29_v11 = vsub.f32 %v27_v9, %v28_v10  ;;  %v59_v30 = vadd.s32 1, %v50_v24  ;;  %v51_v31 = vand.u32 1, %v50_v24  ;;  %v55_v36 = vand.u32 2, %v50_v24 }
  0x83   :  { %v31_v13 = vsub.f32 %v29_v11, %v30_v12  ;;  %v60_v35 = vand.u32 2, %v59_v30  ;;  %vm52_vm0 = vcmp.ne.s32.totalorder %v51_v31, 0  ;;  %vm56_vm2 = vcmp.ne.s32.totalorder %v55_v36, 0 }
  0x85   :  { %v32_v14 = vmul.f32 %v31_v13, %v31_v13  ;;  %vm61_vm1 = vcmp.ne.s32.totalorder %v60_v35, 0 }
  0x87   :  { %v33_v15 = vmul.f32 -0.00019515296, %v32_v14  ;;  %v40_v16 = vmul.f32 2.4433157e-05, %v32_v14  ;;  %v46_v29 = vmul.f32 0.5, %v32_v14 }
  0x89   :  { %v34_v17 = vadd.f32 0.008332161, %v33_v15  ;;  %v91_v19 = vadd.f32 -0.0013887316, %v40_v16 }
  0x8b   :  { %v35_v20 = vmul.f32 %v34_v17, %v32_v14  ;;  %v42_v21 = vmul.f32 %v91_v19, %v32_v14 }
  0x8d   :  { %v90_v22 = vadd.f32 -0.16666655, %v35_v20  ;;  %v43_v23 = vadd.f32 0.041666646, %v42_v21 }
  0x8f   :  { %v37_v25 = vmul.f32 %v90_v22, %v32_v14  ;;  %v44_v26 = vmul.f32 %v43_v23, %v32_v14 }
  0x91   :  { %v38_v27 = vmul.f32 %v37_v25, %v31_v13  ;;  %v45_v28 = vmul.f32 %v44_v26, %v32_v14 }
  0x93   :  { %v47_v32 = vsub.f32 %v45_v28, %v46_v29  ;;  %v39_v33 = vadd.f32 %v38_v27, %v31_v13 }
  0x95   :  { %v48_v34 = vadd.f32 1.0, %v47_v32 }
  0x97   :  { %v54_v37 = vsel %vm52_vm0, %v39_v33, %v48_v34  ;;  %v53_v38 = vsel %vm52_vm0, %v48_v34, %v39_v33 }
  0x98   :  { %v62_v39 = vsub.f32 0.0, %v54_v37  ;;  %v57_v40 = vsub.f32 0.0, %v53_v38 }
  0x9a   :  { %v63_v41 = vsel %vm61_vm1, %v62_v39, %v54_v37  ;;  %v58_v42 = vsel %vm56_vm2, %v57_v40, %v53_v38 }
  0x9b   :  { %v65_v43 = vmul.f32 0.125, %v63_v41  ;;  %v64_v44 = vmul.f32 0.125, %v58_v42 }
  0x9d   :  { %69 = vrot.lane.b32.xlu0 %v65_v43, %s126_s0  ;;  %67 = vst.msk [vmem:[#allocation2] sm:$0xff] %vm66_vm3, %v64_v44 }
 0x10f   :  { %v70_v45 = vpop.permute.xlu0 %69 }
 0x110   :  { %73 = vst.msk [vmem:[#allocation2] sm:$0xff] %vm72_vm4, %v70_v45 }
 0x111   :  { %84 = dma.vmem_to_hbm [thread:$0]  %s80_s13, 128, %s82_s16, [#allocation3]  }
 0x112   :  { %123 = dma.done.wait [#allocation3], 128  }
 0x113   :  { %124 = vsyncadd [#allocation3], 4294967168 }
 0x114   :  { %89 = vsyncpa [#allocation3], 1 }

</bundles_post_ra>
